<compile_context>
chip_gen: v5e
topology: v5e:2x2
jax: 0.10.0
libtpu: 0.0.40
codegen_flags: <defaults>
</compile_context>

<pallas_src>
import jax
import jax.numpy as jnp
from jax.experimental import pallas as pl
from jax.experimental.pallas import tpu as pltpu

LEAKY_SLOPE = 0.2
PIXELNORM_EPS = 1e-8


# ----------------------------------------------------------------------------
# Fused Pallas kernel: all groups x all layers in one grid
#   grid = (G, L);  g is "parallel", l is "arbitrary" (innermost, carries state)
# ----------------------------------------------------------------------------
def fused_mapper_kernel(x_ref, w_ref, b_ref, o_ref, acc_ref):
    """One grid step = (group g, layer l).

    x_ref : (1, M, D)     this group's (padded) rows, f32      [constant over l]
    w_ref : (1, 1, D, D)  layer-l weight of group g, bf16      [streamed per l]
    b_ref : (1, 1, 1, D)  layer-l bias of group g, f32         [streamed per l]
    o_ref : (1, M, D)     output rows of group g               [resident over l]
    acc_ref: (M, D) f32   VMEM scratch carrying the activation across l
    """
    l = pl.program_id(1)

    # PixelNorm once per group (zero-padded rows stay exactly zero).
    @pl.when(l == 0)
    def _():
        x0 = x_ref[0].astype(jnp.float32)
        acc_ref[...] = x0 * jax.lax.rsqrt(
            jnp.mean(x0 * x0, axis=-1, keepdims=True) + PIXELNORM_EPS
        )

    x = acc_ref[...]                               # (M, D) f32
    w = w_ref[0, 0]                                # (D, D) bf16
    b = b_ref[0, 0]                                # (1, D) f32
    y = jnp.dot(x.astype(w.dtype), w, preferred_element_type=jnp.float32) + b
    acc_ref[...] = jnp.maximum(y, LEAKY_SLOPE * y)  # LeakyReLU(0.2)

    @pl.when(l == pl.num_programs(1) - 1)
    def _():
        o_ref[0] = acc_ref[...].astype(o_ref.dtype)


def fused_mapper_forward(x_groups, w_stacked, b_stacked):
    """x_groups: (G, M, D) f32;  w_stacked: (G, L, D, D) bf16;
    b_stacked: (G, L, 1, D) f32  ->  (G, M, D) f32."""
    G, M, D = x_groups.shape
    L = w_stacked.shape[1]

    flops = int(2 * G * M * D * D * L)
    bytes_accessed = int(
        2 * G * M * D * 4                                    # x in + out (f32)
        + w_stacked.size * jnp.dtype(w_stacked.dtype).itemsize
        + b_stacked.size * 4
    )

    return pl.pallas_call(
        fused_mapper_kernel,
        out_shape=jax.ShapeDtypeStruct((G, M, D), x_groups.dtype),
        grid_spec=pltpu.PrefetchScalarGridSpec(
            num_scalar_prefetch=0,
            grid=(G, L),
            in_specs=[
                pl.BlockSpec((1, M, D), lambda g, l: (g, 0, 0)),
                pl.BlockSpec((1, 1, D, D), lambda g, l: (g, l, 0, 0)),
                pl.BlockSpec((1, 1, 1, D), lambda g, l: (g, l, 0, 0)),
            ],
            out_specs=pl.BlockSpec((1, M, D), lambda g, l: (g, 0, 0)),
            scratch_shapes=[pltpu.VMEM((M, D), jnp.float32)],
        ),
        compiler_params=pltpu.CompilerParams(
            dimension_semantics=("parallel", "arbitrary"),
        ),
        cost_estimate=pl.CostEstimate(
            flops=flops, transcendentals=int(G * M), bytes_accessed=bytes_accessed
        ),
    )(x_groups, w_stacked, b_stacked)


# ----------------------------------------------------------------------------
# Parameter construction + module wrapper (plain JAX glue)
# ----------------------------------------------------------------------------
def _round_up(x, m):
    return ((x + m - 1) // m) * m


def init_layers_group(key, latent_dim, layers_in_group, weight_dtype):
    kw, kb = jax.random.split(key)
    scale = 1.0 / jnp.sqrt(jnp.float32(latent_dim))
    weights = (
        jax.random.normal(kw, (layers_in_group, latent_dim, latent_dim), jnp.float32)
        * scale
    ).astype(weight_dtype)
    biases = (
        jax.random.normal(kb, (layers_in_group, 1, latent_dim), jnp.float32) * 0.01
    )
    return weights, biases


class LatentMapperPallas:
    """JAX/Pallas equivalent of the PyTorch `LatentMapper`."""

    def __init__(
        self,
        latent_dim=512,
        layers_in_group=4,
        edit_coarse=True,
        edit_medium=True,
        edit_fine=True,
        weight_dtype=jnp.bfloat16,   # bf16 weights halve HBM traffic; math is f32
        key=jax.random.PRNGKey(0),
    ):
        self.latent_dim = latent_dim
        self.layers_in_group = layers_in_group
        self.edit = (edit_coarse, edit_medium, edit_fine)
        keys = jax.random.split(key, 3)
        self.group_params = []
        for enabled, k in zip(self.edit, keys):
            self.group_params.append(
                init_layers_group(k, latent_dim, layers_in_group, weight_dtype)
                if enabled
                else None
            )
        # Pre-stacked parameters for the enabled groups (one fused kernel call).
        self.enabled_groups = [g for g in range(3) if self.group_params[g] is not None]
        if self.enabled_groups:
            self.w_stacked = jnp.stack(
                [self.group_params[g][0] for g in self.enabled_groups], axis=0
            )
            self.b_stacked = jnp.stack(
                [self.group_params[g][1] for g in self.enabled_groups], axis=0
            )
        else:
            self.w_stacked = None
            self.b_stacked = None

    def __call__(self, x):
        # x: (B, N_STYLES, D); coarse = [:5], medium = [5:8], fine = [8:]
        B, N, D = x.shape
        assert D == self.latent_dim
        counts = [min(5, N), max(0, min(8, N) - 5), max(0, N - 8)]
        slices = [slice(0, 5), slice(5, 8), slice(8, N)]

        # Groups that actually run through the kernel (enabled and non-empty).
        active = [g for g in range(3) if self.edit[g] and counts[g] > 0]

        out_groups = None
        if active:
            M_pad = _round_up(max(B * counts[g] for g in active), 8)
            x_parts = []
            for g in active:
                xp = x[:, slices[g], :].reshape(-1, D)           # (B*counts[g], D)
                xp = jnp.pad(xp, ((0, M_pad - xp.shape[0]), (0, 0)))
                x_parts.append(xp)
            x_groups = jnp.stack(x_parts, axis=0)                # (G, M_pad, D)

            # Select the weight/bias stacks for the active groups (usually all
            # enabled groups -> reuse the precomputed stacks directly).
            positions = [self.enabled_groups.index(g) for g in active]
            if positions == list(range(len(self.enabled_groups))):
                w_stacked, b_stacked = self.w_stacked, self.b_stacked
            else:
                idx = jnp.asarray(positions, dtype=jnp.int32)
                w_stacked = self.w_stacked[idx]
                b_stacked = self.b_stacked[idx]

            out_groups = fused_mapper_forward(x_groups, w_stacked, b_stacked)

        parts = []
        j = 0
        for g in range(3):
            cnt = counts[g]
            if cnt == 0:
                continue
            if g in active:
                y = out_groups[j, : B * cnt].reshape(B, cnt, D)
                j += 1
            else:
                y = jnp.zeros((B, cnt, D), x.dtype)
            parts.append(y)
        return jnp.concatenate(parts, axis=1)


# ----------------------------------------------------------------------------
# Pure-JAX reference (uses the same stored params, incl. bf16 weights)
# ----------------------------------------------------------------------------
def layers_group_ref(x2d, weights, biases):
    x = x2d.astype(jnp.float32)
    x = x * jax.lax.rsqrt(jnp.mean(x * x, axis=-1, keepdims=True) + PIXELNORM_EPS)
    for i in range(weights.shape[0]):
        y = (
            jnp.dot(
                x.astype(weights.dtype), weights[i], preferred_element_type=jnp.float32
            )
            + biases[i]
        )
        x = jnp.maximum(y, LEAKY_SLOPE * y)
    return x


def latent_mapper_ref(mapper, x):
    B, N, D = x.shape
    slices = [slice(0, 5), slice(5, 8), slice(8, N)]
    parts = []
    for sl, enabled, params in zip(slices, mapper.edit, mapper.group_params):
        xp = x[:, sl, :]
        if xp.shape[1] == 0:
            continue
        if enabled and params is not None:
            w, b = params
            parts.append(layers_group_ref(xp.reshape(-1, D), w, b).reshape(xp.shape))
        else:
            parts.append(jnp.zeros_like(xp))
    return jnp.concatenate(parts, axis=1)


if __name__ == "__main__":
    # Small synthetic config: batch=2, 18 style layers (>= 9 needed for the split),
    # latent_dim=32, layers_in_group=4.
    B, N_STYLES, D = 2, 18, 32
    key = jax.random.PRNGKey(0)
    k_x, k_params = jax.random.split(key)

    x = jax.random.normal(k_x, (B, N_STYLES, D), jnp.float32)

    mapper = LatentMapperPallas(latent_dim=D, layers_in_group=4, key=k_params)

    out = jax.block_until_ready(mapper(x))
    assert out.shape == (B, N_STYLES, D), out.shape

    ref = jax.block_until_ready(latent_mapper_ref(mapper, x))
    assert jnp.allclose(out, ref, atol=1e-3, rtol=1e-3), "mismatch vs JAX reference"

    print("KERNEL_OK")
</pallas_src>

<mosaic_0001>
module attributes {stable_mosaic.version = 11 : i64} {
  func.func @fused_mapper_kernel(%arg0: i32, %arg1: i32, %arg2: memref<1x24x32xf32, #tpu.memory_space<vmem>>, %arg3: memref<1x1x32x32xbf16, #tpu.memory_space<vmem>>, %arg4: memref<1x1x1x32xf32, #tpu.memory_space<vmem>>, %arg5: memref<1x24x32xf32, #tpu.memory_space<vmem>>, %arg6: memref<24x32xf32, #tpu.memory_space<vmem>>) attributes {dimension_semantics = [#tpu.dimension_semantics<parallel>, #tpu.dimension_semantics<arbitrary>], iteration_bounds = array<i64: 3, 4>, scalar_prefetch = 0 : i64, scratch_operands = 1 : i64, tpu.core_type = #tpu.core_type<tc>, window_params = [{transform_indices = @transform_0, window_bounds = array<i64: 1, 24, 32>}, {transform_indices = @transform_1, window_bounds = array<i64: 1, 1, 32, 32>}, {transform_indices = @transform_2, window_bounds = array<i64: 1, 1, 1, 32>}, {transform_indices = @transform_3, window_bounds = array<i64: 1, 24, 32>}]} {
    %c0_i32 = arith.constant 0 : i32
    %0 = arith.cmpi eq, %arg1, %c0_i32 : i32
    %1 = arith.extui %0 : i1 to i32
    %c0_i32_0 = arith.constant 0 : i32
    %2 = arith.cmpi ne, %1, %c0_i32_0 : i32
    scf.if %2 {
      %c0_14 = arith.constant 0 : index
      %c0_15 = arith.constant 0 : index
      %c0_16 = arith.constant 0 : index
      %19 = vector.load %arg2[%c0_14, %c0_15, %c0_16] : memref<1x24x32xf32, #tpu.memory_space<vmem>>, vector<1x24x32xf32>
      %20 = vector.shape_cast %19 : vector<1x24x32xf32> to vector<24x32xf32>
      %21 = arith.mulf %20, %20 : vector<24x32xf32>
      %cst_17 = arith.constant dense<0.000000e+00> : vector<24xf32>
      %22 = vector.multi_reduction <add>, %21, %cst_17 [1] : vector<24x32xf32> to vector<24xf32>
      %23 = vector.shape_cast %22 : vector<24xf32> to vector<24x1xf32>
      %cst_18 = arith.constant 3.200000e+01 : f32
      %24 = vector.broadcast %cst_18 : f32 to vector<24x1xf32>
      %25 = arith.divf %23, %24 : vector<24x1xf32>
      %cst_19 = arith.constant 9.99999993E-9 : f32
      %26 = vector.broadcast %cst_19 : f32 to vector<24x1xf32>
      %27 = arith.addf %25, %26 : vector<24x1xf32>
      %28 = math.rsqrt %27 : vector<24x1xf32>
      %29 = vector.broadcast %28 : vector<24x1xf32> to vector<24x32xf32>
      %30 = arith.mulf %20, %29 : vector<24x32xf32>
      %c0_20 = arith.constant 0 : index
      %c0_21 = arith.constant 0 : index
      %31 = vector.load %arg6[%c0_20, %c0_21] : memref<24x32xf32, #tpu.memory_space<vmem>>, vector<24x32xf32>
      tpu.vector_store %arg6[%c0_20, %c0_21], %30 {strides = array<i32>} : memref<24x32xf32, #tpu.memory_space<vmem>>, vector<24x32xf32>,
    } else {
    }
    %c0 = arith.constant 0 : index
    %c0_1 = arith.constant 0 : index
    %3 = vector.load %arg6[%c0, %c0_1] : memref<24x32xf32, #tpu.memory_space<vmem>>, vector<24x32xf32>
    %c0_2 = arith.constant 0 : index
    %c0_3 = arith.constant 0 : index
    %c0_4 = arith.constant 0 : index
    %c0_5 = arith.constant 0 : index
    %4 = vector.load %arg3[%c0_2, %c0_3, %c0_4, %c0_5] : memref<1x1x32x32xbf16, #tpu.memory_space<vmem>>, vector<1x1x32x32xbf16>
    %5 = vector.shape_cast %4 : vector<1x1x32x32xbf16> to vector<32x32xbf16>
    %c0_6 = arith.constant 0 : index
    %c0_7 = arith.constant 0 : index
    %c0_8 = arith.constant 0 : index
    %c0_9 = arith.constant 0 : index
    %6 = vector.load %arg4[%c0_6, %c0_7, %c0_8, %c0_9] : memref<1x1x1x32xf32, #tpu.memory_space<vmem>>, vector<1x1x1x32xf32>
    %7 = vector.shape_cast %6 : vector<1x1x1x32xf32> to vector<1x32xf32>
    %8 = arith.truncf %3 : vector<24x32xf32> to vector<24x32xbf16>
    %cst = arith.constant dense<0.000000e+00> : vector<24x32xf32>
    %9 = tpu.matmul %8, %5, %cst {dimension_numbers = #tpu.dot_dimension_numbers<[1], [0], [0], [1], [0, 0, 1, 1], [], []>} : vector<24x32xbf16>, vector<32x32xbf16>, vector<24x32xf32> -> vector<24x32xf32>
    %10 = vector.broadcast %7 : vector<1x32xf32> to vector<24x32xf32>
    %11 = arith.addf %9, %10 : vector<24x32xf32>
    %cst_10 = arith.constant 2.000000e-01 : f32
    %12 = vector.broadcast %cst_10 : f32 to vector<24x32xf32>
    %13 = arith.mulf %12, %11 : vector<24x32xf32>
    %14 = arith.maximumf %11, %13 : vector<24x32xf32>
    %c0_11 = arith.constant 0 : index
    %c0_12 = arith.constant 0 : index
    %15 = vector.load %arg6[%c0_11, %c0_12] : memref<24x32xf32, #tpu.memory_space<vmem>>, vector<24x32xf32>
    tpu.vector_store %arg6[%c0_11, %c0_12], %14 {strides = array<i32>} : memref<24x32xf32, #tpu.memory_space<vmem>>, vector<24x32xf32>,
    %c3_i32 = arith.constant 3 : i32
    %16 = arith.cmpi eq, %arg1, %c3_i32 : i32
    %17 = arith.extui %16 : i1 to i32
    %c0_i32_13 = arith.constant 0 : i32
    %18 = arith.cmpi ne, %17, %c0_i32_13 : i32
    scf.if %18 {
      %c0_14 = arith.constant 0 : index
      %c0_15 = arith.constant 0 : index
      %19 = vector.load %arg6[%c0_14, %c0_15] : memref<24x32xf32, #tpu.memory_space<vmem>>, vector<24x32xf32>
      %c0_16 = arith.constant 0 : index
      %c0_17 = arith.constant 0 : index
      %c0_18 = arith.constant 0 : index
      %20 = vector.load %arg5[%c0_16, %c0_17, %c0_18] : memref<1x24x32xf32, #tpu.memory_space<vmem>>, vector<1x24x32xf32>
      %21 = vector.shape_cast %20 : vector<1x24x32xf32> to vector<24x32xf32>
      %22 = vector.shape_cast %19 : vector<24x32xf32> to vector<1x24x32xf32>
      tpu.vector_store %arg5[%c0_16, %c0_17, %c0_18], %22 {strides = array<i32>} : memref<1x24x32xf32, #tpu.memory_space<vmem>>, vector<1x24x32xf32>,
    } else {
    }
    return
  }
  func.func @transform_0(%arg0: i32, %arg1: i32) -> (i32, i32, i32) {
    %c0_i32 = arith.constant 0 : i32
    %c0_i32_0 = arith.constant 0 : i32
    %c0_i32_1 = arith.constant 0 : i32
    return %arg0, %c0_i32, %c0_i32_0 : i32, i32, i32
  }
  func.func @transform_1(%arg0: i32, %arg1: i32) -> (i32, i32, i32, i32) {
    %c0_i32 = arith.constant 0 : i32
    %c0_i32_0 = arith.constant 0 : i32
    %c0_i32_1 = arith.constant 0 : i32
    return %arg0, %arg1, %c0_i32, %c0_i32_0 : i32, i32, i32, i32
  }
  func.func @transform_2(%arg0: i32, %arg1: i32) -> (i32, i32, i32, i32) {
    %c0_i32 = arith.constant 0 : i32
    %c0_i32_0 = arith.constant 0 : i32
    %c0_i32_1 = arith.constant 0 : i32
    return %arg0, %arg1, %c0_i32, %c0_i32_0 : i32, i32, i32, i32
  }
  func.func @transform_3(%arg0: i32, %arg1: i32) -> (i32, i32, i32) {
    %c0_i32 = arith.constant 0 : i32
    %c0_i32_0 = arith.constant 0 : i32
    %c0_i32_1 = arith.constant 0 : i32
    return %arg0, %c0_i32, %c0_i32_0 : i32, i32, i32
  }
}

</mosaic_0001>

<bundles_post_ra>
// kernel: tpu_custom_call.1
= control target key start
LH: loop header
LB: loop body
LE: loop exit
PB: predicated region body
PF: predicated region fallthrough
CT: control target
= control target key end

     0   :  { %s1248_s0 = inlined_call_operand.hbm [shape: f32[3,24,32], index: 0, kind: input, shape index: {}]   ;;  %s1249_s1 = inlined_call_operand.hbm [shape: bf16[3,4,32,32], index: 1, kind: input, shape index: {}]   ;;  %s1250_s2 = inlined_call_operand.hbm [shape: f32[3,4,1,32], index: 2, kind: input, shape index: {}]   ;;  %s1251_s3 = inlined_call_operand.hbm [shape: f32[3,24,32], index: 3, kind: output, shape index: {}]  }
   0x1   :  { %1262 = sst [smem:[#allocation23_spill]] %s1249_s1 }
   0x2   :  { %1263 = sst [smem:[#allocation24_spill]] %s1251_s3 }
   0x3   :  { %8 = vsyncpa [#allocation4], 0 }
   0x4   :  { %10 = vsyncpa [#allocation4 + $0x1], 0 }
   0x5   :  { %11 = vsyncpa [#allocation7], 0 }
   0x6   :  { %13 = vsyncpa [#allocation7 + $0x1], 0 }
   0x7   :  { %14 = vsyncpa [#allocation5], 0 }
   0x8   :  { %16 = vsyncpa [#allocation5 + $0x1], 0  ;;  %s976_s12 = smov 0   ;;  %s978_s13 = smov 0  }
   0x9   :  { %s980_s14 = smov 0   ;;  %s982_s15 = smov 0  }
   0xa   :  { %s984_s16 = smov 0   ;;  %s986_s17 = smov 0  }
   0xb   :  { %s988_s18 = smov 0   ;;  %s990_s19 = smov 0  }
   0xc   :  { %s992_s20 = smov 0   ;;  %s994_s21 = smov 0  }
   0xd   :  { %s996_s22 = smov 0  }
   0xe LB: > { %1264 = sst [smem:[#allocation13_spill]] %s919_s15  ;;  %s1030_s23 = sadd.s32 4294967295, %s947_s22   ;;  %s947_s22 = sphi %s996_s22, %s22_s22   ;;  %s943_s21 = sphi %s994_s21, %s1305_s21   ;;  %s939_s20 = sphi %s992_s20, %s1304_s20   ;;  %s935_s19 = sphi %s990_s19, %s1303_s19   ;;  %s931_s18 = sphi %s988_s18, %s1302_s18   ;;  %s927_s17 = sphi %s986_s17, %s1294_s17   ;;  %s923_s16 = sphi %s984_s16, %s1301_s16   ;;  %s919_s15 = sphi %s982_s15, %s1300_s15   ;;  %s915_s14 = sphi %s980_s14, %s1299_s14   ;;  %s911_s13 = sphi %s978_s13, %s1298_s13   ;;  %s907_s12 = sphi %s976_s12, %s1297_s12  }
   0xf   : > { %1265 = sst [smem:[#allocation14_spill]] %s927_s17  ;;  %s31_s24 = sadd.s32 1, %s939_s20 }
  0x10   : > { %1266 = sst [smem:[#allocation15_spill]] %s931_s18  ;;  %p32_p0 = scmp.ge.s32.totalorder %s31_s24, 4 }
  0x11   : > { %1267 = sst [smem:[#allocation16_spill]] %s935_s19  ;;  %s34_s25 = sadd.s32 1, %s943_s21 }
  0x12   : > { %p49_p1 = scmp.eq.s32.totalorder %s947_s22, 0  ;;  %p55_p2 = scmp.eq.s32.totalorder %s1030_s23, 0 }
  0x13   : > { %s1307_s24 = smov (%p32_p0, %s31_s24), 0  ;;  %s1309_s25 = smov (!%p32_p0, %s34_s25), %s943_s21 }
  0x14   : > { %1268 = sst [smem:[#allocation17_spill]] %s1307_s24  ;;  %s65_s26 = ssub.s32 %s939_s20, %s1307_s24 }
  0x15   : > { %s69_s27 = sadd.s32 1, %s915_s14  ;;  %p36_p3 = scmp.ge.s32.totalorder %s1309_s25, 3 }
  0x16   : > { %p76_p4 = scmp.ne.s32.totalorder %s915_s14, %s911_s13  ;;  %p82_p5 = scmp.ne.s32.totalorder %s911_s13, %s907_s12 }
  0x17   : > { %s1311_s25 = smov (%p36_p3, %s1309_s25), 0  ;;  %p1254_p8 = scmp.lt.s32.totalorder %s947_s22, 12 }
  0x18   : > { %1269 = sst [smem:[#allocation18_spill]] %s1311_s25  ;;  %p1049_p6 = por %p76_p4, %p49_p1 }
  0x19   : > { %p1055_p7 = por %p82_p5, %p55_p2  ;;  %s1061_s30 = ssub.s32 %s943_s21, %s1311_s25 }
  0x1a   : > { %p39_p9 = scmp.eq.s32.totalorder %s1061_s30, 0  ;;  %s66_s4 = sor.u32 %s65_s26, %s1061_s30 }
  0x1b   : > { %p67_p10 = scmp.eq.s32.totalorder %s66_s4, 0  ;;  %s182_s5 = sand.u32 1, %s947_s22  }
  0x1c   : > { %s1255_s6 = sand.u32 1, %s915_s14   ;;  %s574_s9 = sshll.u32 %s939_s20, 2 }
  0x1d   : > { %s1069_s7 = scalar_select %p67_p10, %s915_s14, %s69_s27  }
  0x1e   : > { %s573_s8 = sshll.u32 %s1255_s6, 4  ;;  %s575_s10 = sshll.u32 %s943_s21, 4 }
  0x1f   : > { %1272 = sst [smem:[#allocation19_spill]] %s1069_s7  ;;  %s191_s11 = sadd.s32 %s575_s10, %s574_s9 }
  0x20   : > { %s186_s12 = scalar_lea.vmem [#allocation6], %s573_s8  ;;  %s576_s24 = sshll.u32 %s191_s11, 2 }
  0x21   : > { %s196_s25 = sshll.u32 %s186_s12, 4  ;;  %s1273_s1 = sld [smem:[#allocation23_spill]]  ;;  %s197_s25 = int_to_ptr.vmem [resolvable:$true] %s196_s25 }
  0x22   : > { %p1082_p11 = pnand %p1254_p8, %p1049_p6  ;;  %p578_p12 = scmp.ge.s32.totalorder %s947_s22, 1 }
  0x23   : > { %s1087_s10 = scalar_lea.sflag [#allocation7], %s182_s5  ;;  %s949_s11 = smov 64  }
  0x24   : > { %s950_s12 = smov 4   ;;  %p223_p13 = scmp.lt.s32.totalorder %s947_s22, 13 }
  0x25   : > { %s569_s28 = sadd.s32 4294967294, %s947_s22   ;;  %s41_s26 = sadd.s32 1, %s927_s17 }
  0x26   : > { %p1093_p0 = pnand %p578_p12, %p223_p13  ;;  %p48_p3 = scmp.ne.s32.totalorder %s927_s17, %s923_s16 }
  0x27   : > { %s193_s27 = scalar_lea.hbm %s1273_s1, %s576_s24  ;;  %p54_p4 = scmp.ne.s32.totalorder %s923_s16, %s919_s15 }
  0x28   : > { %s194_s8 = sshll.u32 %s193_s27, 4  ;;  %p134_p5 = scmp.eq.s32.totalorder %s1030_s23, 11  ;;  %s195_s8 = int_to_ptr.hbm [resolvable:$true] %s194_s8 }
  0x29   : > { %617 = dma.hbm_to_vmem [thread:$0]  (!%p1082_p11), %s195_s8, 256, %s197_s25, %s1087_s10, %s949_s11, %s949_s11, %s950_s12  }
  0x2a   : > { %s1102_s4 = scalar_select %p39_p9, %s927_s17, %s41_s26  }
  0x2b   : > { %p140_p6 = scmp.eq.s32.totalorder %s569_s28, 11  ;;  %p50_p10 = por %p49_p1, %p48_p3 }
  0x2c   : > { %1276 = sst [smem:[#allocation20_spill]] %s1102_s4  ;;  %p1113_p8 = por %p55_p2, %p54_p4 }
  0x2d   : > { %p1117_p12 = por %p134_p5, %p48_p3  ;;  %p1121_p13 = por %p140_p6, %p54_p4 }
  0x2e   : > { %s160_s27 = sand.u32 1, %s927_s17   ;;  %s600_s8 = smul.u32 24, %s943_s21 }
  0x2f   : > { %s1278_s5 = scalar_select %p1117_p12, 1, 0 }
  0x30   : > { %s1280_s30 = scalar_select %p1121_p13, 1, 0 }
  0x31   : > { %1279 = sst [smem:[#allocation21_spill]] %s1278_s5  ;;  %s599_s11 = smul.u32 24, %s160_s27 }
  0x32   : > { %1281 = sst [smem:[#allocation22_spill]] %s1280_s30  ;;  %s169_s26 = scalar_lea.hbm %s1248_s0, %s600_s8 }
  0x33   : > { %p1282_p1 = scmp.lt.s32.totalorder %s947_s22, 12  ;;  %s170_s6 = sshll.u32 %s169_s26, 4  ;;  %s171_s6 = int_to_ptr.hbm [resolvable:$true] %s170_s6 }
  0x34   : > { %s164_s1 = scalar_lea.vmem [#allocation3], %s599_s11  ;;  %s161_s7 = scalar_lea.sflag [#allocation4], %s160_s27 }
  0x35   : > { %p612_p2 = pnand %p1282_p1, %p50_p10  ;;  %s172_s4 = sshll.u32 %s164_s1, 4  ;;  %s173_s4 = int_to_ptr.vmem [resolvable:$true] %s172_s4 }
  0x36   : > { %s951_s30 = smov 128   ;;  %s952_s15 = smov 8  }
  0x37   : > { %614 = dma.hbm_to_vmem [thread:$0]  (!%p612_p2), %s171_s6, 384, %s173_s4, %s161_s7, %s951_s30, %s951_s30, %s952_s15  }
  0x38   : > { %s577_s17 = sshll.u32 %s943_s21, 2  ;;  %s1283_s5 = sand.u32 1, %s915_s14  }
  0x39   : > { %s213_s3 = sadd.s32 %s939_s20, %s577_s17  ;;  %s209_s19 = scalar_lea.vmem [#allocation8], %s1283_s5 }
  0x3a   : > { %s218_s18 = sshll.u32 %s209_s19, 4  ;;  %s214_s28 = scalar_lea.hbm %s1250_s2, %s213_s3  ;;  %s219_s18 = int_to_ptr.vmem [resolvable:$true] %s218_s18 }
  0x3b   : > { %s216_s26 = sshll.u32 %s214_s28, 4  ;;  %227 = sbr.rel (%p1093_p0) target bundleno = 418 (0x1a2), region = 32  ;;  %s217_s26 = int_to_ptr.hbm [resolvable:$true] %s216_s26 }
  0x3c   : > { %620 = dma.hbm_to_vmem [thread:$0]  (!%p1082_p11), %s217_s26, 16, %s219_s18, %s1087_s10  }
  0x3d   : > { %s1145_s1 = sand.u32 (!%p1093_p0), 1, %s923_s16  }
  0x3e   : > { %s601_s15 = smul.u32 (!%p1093_p0), 24, %s1145_s1  ;;  %s230_s17 = scalar_lea.sflag (!%p1093_p0), [#allocation4], %s1145_s1 }
  0x40   : > { %s233_s19 = scalar_lea.vmem [#allocation3], %s601_s15 }
  0x41   : > { %894 = dma.done.wait (%p1113_p8), %s230_s17, 384  }
  0x42   : > { %896 = vsyncadd (%p1113_p8), %s230_s17, 4294966912  ;;  %s239_s3 = sand.u32 1, %s1030_s23   ;;  %s241_s18 = sand.u32 1, %s911_s13  }
  0x43   : > { %s1155_s6 = sshll.u32 %s241_s18, 4  ;;  %s240_s7 = scalar_lea.sflag [#allocation7], %s239_s3 }
  0x44   : > { %s243_s9 = scalar_lea.vmem [#allocation6], %s1155_s6 }
  0x45   : > { %898 = dma.done.wait (%p1055_p7), %s240_s7, 272  }
  0x46   : > { %900 = vsyncadd (%p1055_p7), %s240_s7, 4294967024  ;;  %s1162_s10 = scalar_lea.vmem [#allocation8], %s241_s18  ;;  %s1164_s24 = scalar_lea.vmem [#allocation9], %s601_s15 }
  0x47   : > { %s1284_s4 = sld [smem:[#allocation15_spill]] }
  0x4d   : > { %p580_p8 = scmp.ne.s32.totalorder %s1284_s4, 0 }
  0x4f   : > { %289 = sbr.rel (%p580_p8) target bundleno = 237 (0xed), region = 48 }
  0x54   : > { %v292_v0 = vld [vmem:[%s233_s19 + $0x10] sm:$0xff]  ;;  %vm296_vm0 = vcmask 261120   ;;  %v290_v1 = vld [vmem:[%s233_s19] sm:$0xff]  ;;  %v1167_v4 = vld [vmem:[%s233_s19 + $0x8] sm:$0xff]  ;;  %v953_v9 = vmov 32.0  }
  0x55   : > { %v295_v2 = vmul.f32 %v292_v0, %v292_v0  ;;  %v293_v3 = vmul.f32 %v290_v1, %v290_v1  ;;  %v294_v7 = vmul.f32 %v1167_v4, %v1167_v4  ;;  %722 = vrcp.f32 %v953_v9 }
  0x57   : > { %v303_v5 = vsel %vm296_vm0, %v295_v2, 0.0  ;;  %v297_v6 = vsel %vm296_vm0, %v293_v3, 0.0  ;;  %v300_v8 = vsel %vm296_vm0, %v294_v7, 0.0 }
  0x58   : > { %304 = vadd.xlane.f32.xlu1 %v303_v5  ;;  %298 = vadd.xlane.f32.xlu0 %v297_v6 }
  0x5b   : > { %v723_v10 = vpop.eup %722 }
  0x5c   : > { %v307_v11 = vmul.f32 32.0, %v723_v10  ;;  %vm311_vm1 = vweird.f32 %v723_v10 }
  0x5e   : > { %v308_v12 = vsub.f32 1.0, %v307_v11 }
  0x60   : > { %301 = vadd.xlane.f32.xlu0 %v300_v8  ;;  %v309_v13 = vmul.f32 %v723_v10, %v308_v12 }
  0x62   : > { %v310_v14 = vadd.f32 %v723_v10, %v309_v13 }
  0x64   : > { %v312_v15 = vsel %vm311_vm1, %v723_v10, %v310_v14 }
  0xcb   : > { %v305_v16 = vpop.xlane.xlu1 %304  ;;  %v299_v17 = vpop.xlane.xlu0 %298 }
  0xcc   : > { %v315_v18 = vmul.f32 %v312_v15, %v305_v16  ;;  %v313_v19 = vmul.f32 %v312_v15, %v299_v17 }
  0xce   : > { %v318_v20 = vadd.f32 1e-08, %v315_v18  ;;  %v316_v21 = vadd.f32 1e-08, %v313_v19 }
  0xd0   : > { %724 = vrsqrt.f32 %v318_v20  ;;  %vm345_vm2 = vweird.f32 %v318_v20  ;;  %vm325_vm6 = vweird.f32 %v316_v21 }
  0xd1   : > { %726 = vrsqrt.f32 %v316_v21 }
  0xd3   : > { %v302_v22 = vpop.xlane.xlu0 %301 }
  0xd4   : > { %v314_v23 = vmul.f32 %v312_v15, %v302_v22 }
  0xd6   : > { %v725_v24 = vpop.eup %724  ;;  %v317_v25 = vadd.f32 1e-08, %v314_v23 }
  0xd7   : > { %v727_v26 = vpop.eup %726  ;;  %v340_v27 = vmul.f32 %v725_v24, %v318_v20  ;;  %vm346_vm3 = vweird.f32 %v725_v24 }
  0xd8   : > { %v320_v28 = vmul.f32 %v727_v26, %v316_v21  ;;  %728 = vrsqrt.f32 %v317_v25  ;;  %vm326_vm4 = vweird.f32 %v727_v26  ;;  %vm347_vm5 = vmor %vm345_vm2, %vm346_vm3  ;;  %vm335_vm9 = vweird.f32 %v317_v25 }
  0xd9   : > { %v341_v29 = vmul.f32 %v725_v24, %v340_v27  ;;  %vm327_vm7 = vmor %vm325_vm6, %vm326_vm4 }
  0xda   : > { %v321_v30 = vmul.f32 %v727_v26, %v320_v28 }
  0xdb   : > { %v342_v31 = vmul.f32 0.5, %v341_v29 }
  0xdc   : > { %v322_v32 = vmul.f32 0.5, %v321_v30 }
  0xdd   : > { %v343_v33 = vsub.f32 1.5, %v342_v31 }
  0xde   : > { %v729_v34 = vpop.eup %728  ;;  %v323_v35 = vsub.f32 1.5, %v322_v32 }
  0xdf   : > { %v344_v36 = vmul.f32 %v725_v24, %v343_v33  ;;  %v330_v37 = vmul.f32 %v729_v34, %v317_v25  ;;  %vm336_vm8 = vweird.f32 %v729_v34 }
  0xe0   : > { %v324_v38 = vmul.f32 %v727_v26, %v323_v35  ;;  %vm337_vm10 = vmor %vm335_vm9, %vm336_vm8 }
  0xe1   : > { %v348_v39 = vsel %vm347_vm5, %v725_v24, %v344_v36  ;;  %v331_v40 = vmul.f32 %v729_v34, %v330_v37 }
  0xe2   : > { %v351_v41 = vmul.f32 %v348_v39, %v292_v0  ;;  %v328_v42 = vsel %vm327_vm7, %v727_v26, %v324_v38 }
  0xe3   : > { %v349_v43 = vmul.f32 %v328_v42, %v290_v1  ;;  %v332_v44 = vmul.f32 0.5, %v331_v40 }
  0xe4   : > { %354 = vst.msk [vmem:[#allocation2 + $0x10] sm:$0xff] %vm296_vm0, %v351_v41 }
  0xe5   : > { %352 = vst.msk [vmem:[#allocation2] sm:$0xff] %vm296_vm0, %v349_v43  ;;  %v333_v45 = vsub.f32 1.5, %v332_v44 }
  0xe7   : > { %v334_v46 = vmul.f32 %v729_v34, %v333_v45 }
  0xe9   : > { %v338_v47 = vsel %vm337_vm10, %v729_v34, %v334_v46 }
  0xea   : > { %v350_v48 = vmul.f32 %v338_v47, %v1167_v4 }
  0xec   : > { %353 = vst.msk [vmem:[#allocation2 + $0x8] sm:$0xff] %vm296_vm0, %v350_v48 }
  0xed PF: > { %v596_v49 = vld [vmem:[%s243_s9 + $0x8] sm:$0xff]  ;;  %v595_v50 = vld [vmem:[%s243_s9] sm:$0xff]  ;;  %vm380_vm11 = vcmask 261120   ;;  %s1285_s23 = sld [smem:[#allocation15_spill]] }
  0xee   : > { %393 = vmatpush.bf16.msra.mxu0 %v596_v49  ;;  %597 = vmatpush.bf16.msra.mxu1 %v596_v49  ;;  %v355_v51 = vld [vmem:[#allocation2] sm:$0xff]  ;;  %v357_v53 = vld [vmem:[#allocation2 + $0x10] sm:$0xff] }
  0xef   : > { %v364_v55 = vpack.c.bf16 %v357_v53, %v357_v53  ;;  %v730_v56 = vld [vmem:[%s1162_s10] ss:$0 sm:$0xff] }
  0xf2   : > { %394 = vmatpush.bf16.msra.mxu0 %v595_v50  ;;  %598 = vmatpush.bf16.msra.mxu1 %v595_v50 }
  0xf3   : > { %v356_v52 = vld [vmem:[#allocation2 + $0x8] sm:$0xff]  ;;  %p591_p7 = scmp.ne.s32.totalorder %s1285_s23, 3 }
  0xf4   : > { %v363_v54 = vpack.c.bf16 %v356_v52, %v355_v51 }
  0xf5   : > { %590 = vmatmul.msk.bf16.vlgmr.msra.gmra.mxu1 %vm380_vm11, %v364_v55 }
  0xf6   : > { %589 = vmatmul.msk.bf16.vlgmr.msra.gmra.mxu0 %vm380_vm11, %v363_v54 }
 0x172   : > { %v401_v58 = vpop.f32.mrf.mxu1 }
 0x173   : > { %v396_v57 = vpop.f32.mrf.mxu0  ;;  %v402_v60 = vadd.f32 %v730_v56, %v401_v58 }
 0x174   : > { %v397_v59 = vadd.f32 %v730_v56, %v396_v57 }
 0x175   : > { %v407_v62 = vmul.f32 0.2, %v402_v60 }
 0x176   : > { %v405_v61 = vmul.f32 0.2, %v397_v59 }
 0x177   : > { %v410_v0 = vmax.f32 %v402_v60, %v407_v62 }
 0x178   : > { %v408_v63 = vmax.f32 %v397_v59, %v405_v61 }
 0x179   : > { %413 = vst.msk [vmem:[#allocation2 + $0x10] sm:$0xff] %vm380_vm11, %v410_v0 }
 0x17a   : > { %411 = vst.msk [vmem:[#allocation2] sm:$0xff] %vm380_vm11, %v408_v63  ;;  %v403_v2 = vpop.f32.mrf.mxu1 }
 0x17b   : > { %v398_v1 = vpop.f32.mrf.mxu0 }
 0x17c   : > { %v399_v3 = vadd.f32 %v730_v56, %v398_v1 }
 0x17e   : > { %v406_v4 = vmul.f32 0.2, %v399_v3  ;;  %417 = sbr.rel (%p591_p7) target bundleno = 395 (0x18b), region = 52 }
 0x180   : > { %v409_v5 = vmax.f32 %v399_v3, %v406_v4 }
 0x182   : > { %412 = vst.msk [vmem:[#allocation2 + $0x8] sm:$0xff] %vm380_vm11, %v409_v5 }
 0x183   : > { %v418_v6 = vld [vmem:[#allocation2] sm:$0xff]  ;;  %v420_v8 = vld [vmem:[#allocation2 + $0x10] sm:$0xff] }
 0x184   : > { %421 = vst.msk [vmem:[%s1164_s24] sm:$0xff] %vm380_vm11, %v418_v6 }
 0x185   : > { %423 = vst.msk [vmem:[%s1164_s24 + $0x10] sm:$0xff] %vm380_vm11, %v420_v8 }
 0x189   : > { %v419_v7 = vld [vmem:[#allocation2 + $0x8] sm:$0xff] }
 0x18a   : > { %422 = vst.msk [vmem:[%s1164_s24 + $0x8] sm:$0xff] %vm380_vm11, %v419_v7 }
 0x18b PF: > { %s1286_s29 = sld [smem:[#allocation16_spill]]  ;;  %s437_s30 = sshll.u32 %s1164_s24, 4  ;;  %s438_s30 = int_to_ptr.vmem [resolvable:$true] %s437_s30 }
 0x18c   : > { %s1288_s12 = sld [smem:[#allocation24_spill]]  ;;  %s425_s15 = scalar_lea.sflag [#allocation5], %s1145_s1 }
 0x191   : > { %s602_s5 = smul.u32 24, %s1286_s29 }
 0x192   : > { %s1289_s8 = smov %s1288_s12 }
 0x193   : > { %s436_s28 = scalar_lea.hbm %s1288_s12, %s602_s5  ;;  %s841_s6 = scalar_lea.hbm %s1289_s8, 72 }
 0x194   : > { %s439_s26 = sshll.u32 %s436_s28, 4  ;;  %s440_s26 = int_to_ptr.hbm [resolvable:$true] %s439_s26 }
 0x195   : > { %s835_s17 = sshra.s32 %s440_s26, 4  ;;  %s836_s17 = int_to_ptr.hbm [resolvable:$true] %s835_s17 }
 0x196   : > { %s837_s19 = scalar_lea.hbm %s836_s17, 24  ;;  %p842_p3 = scmp.lt.s32.totalorder %s836_s17, %s1289_s8 }
 0x197   : > { %p838_p9 = scmp.ne.s32.totalorder %s836_s17, %s837_s19  ;;  %p843_p4 = scmp.lt.s32.totalorder %s841_s6, %s837_s19 }
 0x199   : > { %p839_p11 = pnand %p838_p9, %p1117_p12  ;;  %p844_p5 = por %p843_p4, %p842_p3 }
 0x19b   : > { %p840_p0 = pneg %p839_p11 }
 0x19d   : > { %p845_p6 = pnand %p844_p5, %p840_p0 }
 0x19f   : > { %848 = shalt.err (!%p845_p6)
}
 0x1a0   : > { %s954_s1 = smov 128   ;;  %s955_s10 = smov 8  }
 0x1a1   : > { %609 = dma.vmem_to_hbm [thread:$0]  (%p1117_p12), %s438_s30, 384, %s440_s26, %s425_s15, %s954_s1, %s954_s1, %s955_s10  }
 0x1a2 PF: > { %s1290_s24 = sld [smem:[#allocation13_spill]]  ;;  %p626_p10 = scmp.ge.s32.totalorder %s947_s22, 2 }
 0x1a4   : > { %p622_p1 = pnand %p626_p10, %p1121_p13 }
 0x1a6   : > { %p623_p2 = pneg %p622_p1 }
 0x1a8   : > { %s454_s23 = sand.u32 1, %s1290_s24  }
 0x1a9   : > { %s455_s29 = scalar_lea.sflag [#allocation5], %s454_s23 }
 0x1aa   : > { %902 = dma.done.wait (%p623_p2), %s455_s29, 384  }
 0x1ab   : > { %904 = vsyncadd (%p623_p2), %s455_s29, 4294966912  ;;  %s22_s22 = sadd.s32 1, %s947_s22   ;;  %s1292_s5 = sld [smem:[#allocation19_spill]] }
 0x1ac   : > { %p19_p8 = scmp.ge.s32.totalorder %s22_s22, 14   ;;  %s1293_s25 = sld [smem:[#allocation14_spill]] }
 0x1ad   : > { %s1294_s17 = sld [smem:[#allocation20_spill]]  ;;  %s1297_s12 = smov %s911_s13 }
 0x1ae   : > { %s1295_s30 = sld [smem:[#allocation17_spill]]  ;;  %s1298_s13 = smov %s915_s14 }
 0x1af   : > { %s1296_s27 = sld [smem:[#allocation18_spill]]  ;;  %s1300_s15 = smov %s923_s16 }
 0x1b0   : > { %s1302_s18 = smov %s939_s20  ;;  %s1303_s19 = smov %s943_s21 }
 0x1b1   : > { %s1299_s14 = smov %s1292_s5  ;;  %21 = sbr.rel (!%p19_p8) target bundleno = 14 (0xe), region = 109 }
 0x1b2   : > { %s1301_s16 = smov %s1293_s25 }
 0x1b4   : > { %s1304_s20 = smov %s1295_s30 }
 0x1b5   : > { %s1305_s21 = smov %s1296_s27 }
 0x1b6   :  { %461 = vsyncpa [#allocation4], 1 }
 0x1b7   :  { %463 = vsyncpa [#allocation4 + $0x1], 1 }
 0x1b8   :  { %464 = vsyncpa [#allocation7], 1 }
 0x1b9   :  { %466 = vsyncpa [#allocation7 + $0x1], 1 }
 0x1ba   :  { %467 = vsyncpa [#allocation5], 1 }
 0x1bb   :  { %469 = vsyncpa [#allocation5 + $0x1], 1 }

</bundles_post_ra>
